<compile_context>
chip_gen: v6e
topology: v6e:2x2x1
jax: 0.10.0
libtpu: 0.0.40
codegen_flags: <defaults>
</compile_context>

<pallas_src>
import math

import jax
import jax.numpy as jnp
import numpy as np
from jax.experimental import pallas as pl
from jax.experimental.pallas import tpu as pltpu

EMBED = 32
HEADS = 4
HEAD_DIM = EMBED // HEADS
FF_DIM = 4 * EMBED
EPS = 1e-5


def decoder_layer_kernel(x_ref, wqkv_ref, bqkv_ref, wo_ref, w1_ref, b1_ref,
                         w2_ref, vec_ref, out_ref):
    """One grid step = one batch element.

    x_ref   : (S, E)
    wqkv_ref: (E, 3E)  [Wq*scale | Wk | Wv]   (scale folded at pack time)
    bqkv_ref: (1, 3E)  [bq*scale | bk | bv]
    wo_ref  : (E, E)
    w1_ref  : (E, 4E)
    b1_ref  : (1, 4E)
    w2_ref  : (4E, E)
    vec_ref : (6, E)   [bo ; g1 ; be1 ; g2 ; be2 ; b2]
    out_ref : (S, E)
    """
    S, E = x_ref.shape
    H, D = HEADS, HEAD_DIM

    x = x_ref[...]                                                     # (S, E)

    # --- fused QKV projection: one MXU push with N_out = 3E ---
    qkv = jnp.dot(x, wqkv_ref[...],
                  preferred_element_type=jnp.float32) + bqkv_ref[...]  # (S, 3E)
    q = qkv[:, :E]            # already scaled by 1/sqrt(D) via packed weights
    k = qkv[:, E:2 * E]
    v = qkv[:, 2 * E:]

    # Causal additive bias, computed ONCE (hoisted out of the head loop).
    row = jax.lax.broadcasted_iota(jnp.int32, (S, S), 0)
    col = jax.lax.broadcasted_iota(jnp.int32, (S, S), 1)
    bias = jnp.where(col <= row, 0.0, -1e30).astype(jnp.float32)       # (S, S)

    # TODO(synk): per-head matmuls are far below the 128/256 MXU tile at this
    #             size (latency-bound); re-tile to >=128 query rows per push
    #             before expecting MXU-side gains at scale.
    w_o = wo_ref[...]
    attn = jnp.zeros((S, E), jnp.float32)
    for h in range(H):                               # static unroll over heads
        qh = q[:, h * D:(h + 1) * D]
        kh = k[:, h * D:(h + 1) * D]
        vh = v[:, h * D:(h + 1) * D]

        s = jax.lax.dot_general(qh, kh, (((1,), (1,)), ((), ())),
                                preferred_element_type=jnp.float32) + bias
        s = s - jnp.max(s, axis=-1, keepdims=True)
        p = jnp.exp(s)
        p = p / jnp.sum(p, axis=-1, keepdims=True)   # exact softmax denom
        o_h = jnp.dot(p, vh, preferred_element_type=jnp.float32)       # (S, D)
        # Fold the output projection per head -> no lane-dim concatenate.
        attn = attn + jnp.dot(o_h, w_o[h * D:(h + 1) * D, :],
                              preferred_element_type=jnp.float32)
    attn = attn + vec_ref[0:1, :]                    # + bo

    # --- residual + LayerNorm 1 ---
    g1, be1 = vec_ref[1:2, :], vec_ref[2:3, :]
    h1 = x + attn
    mu = jnp.mean(h1, axis=-1, keepdims=True)
    var = jnp.mean((h1 - mu) ** 2, axis=-1, keepdims=True)
    y1 = (h1 - mu) * jax.lax.rsqrt(var + EPS) * g1 + be1

    # --- FeedForward: Linear(E->4E) -> ReLU -> Linear(4E->E) ---
    f = jnp.dot(y1, w1_ref[...],
                preferred_element_type=jnp.float32) + b1_ref[...]      # (S, 4E)
    f = jnp.maximum(f, 0.0)
    f = jnp.dot(f, w2_ref[...],
                preferred_element_type=jnp.float32) + vec_ref[5:6, :]  # + b2

    # --- residual + LayerNorm 2 ---
    g2, be2 = vec_ref[3:4, :], vec_ref[4:5, :]
    h2 = y1 + f
    mu2 = jnp.mean(h2, axis=-1, keepdims=True)
    var2 = jnp.mean((h2 - mu2) ** 2, axis=-1, keepdims=True)
    out_ref[...] = (h2 - mu2) * jax.lax.rsqrt(var2 + EPS) * g2 + be2


def pack_params(p):
    """ONE-TIME packing (call at init, not per forward).

    Fuses the Q/K/V projection weights, folds the attention scale into the Q
    columns, and stacks the six (1, E) vectors into a single (6, E) slab."""
    scale = 1.0 / math.sqrt(HEAD_DIM)
    wqkv = jnp.concatenate([p["wq"] * scale, p["wk"], p["wv"]], axis=1)  # (E, 3E)
    bqkv = jnp.concatenate([p["bq"] * scale, p["bk"], p["bv"]], axis=1)  # (1, 3E)
    vecs = jnp.concatenate([p["bo"], p["g1"], p["be1"],
                            p["g2"], p["be2"], p["b2"]], axis=0)         # (6, E)
    return {"wqkv": wqkv, "bqkv": bqkv, "wo": p["wo"], "w1": p["w1"],
            "b1": p["b1"], "w2": p["w2"], "vecs": vecs}


def custom_decoder_layer(x, packed):
    """x: (B, S, E) float32.  packed: output of pack_params (pre-packed once)."""
    B, S, E = x.shape

    def full(shape):
        return pl.BlockSpec(shape, lambda b, _s=shape: (0,) * len(_s))

    return pl.pallas_call(
        decoder_layer_kernel,
        out_shape=jax.ShapeDtypeStruct((B, S, E), jnp.float32),
        grid=(B,),
        in_specs=[
            pl.BlockSpec((None, S, E), lambda b: (b, 0, 0)),   # x (per batch)
            full((E, 3 * E)),                                  # wqkv (resident)
            full((1, 3 * E)),                                  # bqkv
            full((E, E)),                                      # wo
            full((E, FF_DIM)),                                 # w1
            full((1, FF_DIM)),                                 # b1
            full((FF_DIM, E)),                                 # w2
            full((6, E)),                                      # vecs
        ],
        out_specs=pl.BlockSpec((None, S, E), lambda b: (b, 0, 0)),
        compiler_params=pltpu.CompilerParams(
            dimension_semantics=("parallel",)),                # megacore on v7x
    )(x, packed["wqkv"], packed["bqkv"], packed["wo"], packed["w1"],
      packed["b1"], packed["w2"], packed["vecs"])


def init_params(key, embed=EMBED):
    """Deterministic synthetic parameters mirroring the PyTorch module shapes.
    PyTorch Linear stores weight as (out, in); we keep (in, out) so the kernel
    does x @ W (equivalent to x @ W_torch.T)."""
    ks = jax.random.split(key, 8)
    s = 0.02
    return {
        "wq": s * jax.random.normal(ks[0], (embed, embed), jnp.float32),
        "wk": s * jax.random.normal(ks[1], (embed, embed), jnp.float32),
        "wv": s * jax.random.normal(ks[2], (embed, embed), jnp.float32),
        "bq": jnp.zeros((1, embed), jnp.float32),
        "bk": jnp.zeros((1, embed), jnp.float32),
        "bv": jnp.zeros((1, embed), jnp.float32),
        "wo": s * jax.random.normal(ks[3], (embed, embed), jnp.float32),
        "bo": 0.01 * jnp.ones((1, embed), jnp.float32),
        "g1": jnp.ones((1, embed), jnp.float32),
        "be1": jnp.zeros((1, embed), jnp.float32),
        "w1": s * jax.random.normal(ks[4], (embed, 4 * embed), jnp.float32),
        "b1": 0.01 * jnp.ones((1, 4 * embed), jnp.float32),
        "w2": s * jax.random.normal(ks[5], (4 * embed, embed), jnp.float32),
        "b2": 0.01 * jnp.ones((1, embed), jnp.float32),
        "g2": jnp.ones((1, embed), jnp.float32),
        "be2": jnp.zeros((1, embed), jnp.float32),
    }


def reference(x, p):
    """Pure-JAX reference of the same forward pass (eval-mode dropout)."""
    B, S, E = x.shape
    q = x @ p["wq"] + p["bq"][0]
    k = x @ p["wk"] + p["bk"][0]
    v = x @ p["wv"] + p["bv"][0]

    def heads(t):
        return t.reshape(B, S, HEADS, HEAD_DIM).transpose(0, 2, 1, 3)

    qh, kh, vh = heads(q), heads(k), heads(v)
    s = jnp.einsum("bhqd,bhkd->bhqk", qh, kh) / math.sqrt(HEAD_DIM)
    mask = jnp.triu(jnp.ones((S, S), bool), 1)
    s = jnp.where(mask, -jnp.inf, s)
    pattn = jax.nn.softmax(s, axis=-1)
    o = jnp.einsum("bhqk,bhkd->bhqd", pattn, vh).transpose(0, 2, 1, 3).reshape(B, S, E)
    o = o @ p["wo"] + p["bo"][0]

    def ln(t, g, b):
        mu = t.mean(-1, keepdims=True)
        var = ((t - mu) ** 2).mean(-1, keepdims=True)
        return (t - mu) / jnp.sqrt(var + EPS) * g[0] + b[0]

    y1 = ln(x + o, p["g1"], p["be1"])
    f = jax.nn.relu(y1 @ p["w1"] + p["b1"][0]) @ p["w2"] + p["b2"][0]
    return ln(y1 + f, p["g2"], p["be2"])


if __name__ == "__main__":
    B, S, E = 2, 8, EMBED
    key = jax.random.PRNGKey(0)
    kx, kp = jax.random.split(key)
    x = jax.random.normal(kx, (B, S, E), jnp.float32)
    params = init_params(kp, E)
    packed = pack_params(params)          # one-time, outside the hot path

    out = custom_decoder_layer(x, packed)
    out = jax.block_until_ready(out)

    ref = reference(x, params)
    # Exact softmax denominator again -> tight tolerance restored.
    np.testing.assert_allclose(np.asarray(out), np.asarray(ref),
                               rtol=1e-4, atol=1e-4)
    print("KERNEL_OK")
</pallas_src>

<mosaic_0001>
module attributes {stable_mosaic.version = 11 : i64} {
  func.func @decoder_layer_kernel(%arg0: i32, %arg1: memref<1x8x32xf32, #tpu.memory_space<vmem>>, %arg2: memref<32x96xf32, #tpu.memory_space<vmem>>, %arg3: memref<1x96xf32, #tpu.memory_space<vmem>>, %arg4: memref<32x32xf32, #tpu.memory_space<vmem>>, %arg5: memref<32x128xf32, #tpu.memory_space<vmem>>, %arg6: memref<1x128xf32, #tpu.memory_space<vmem>>, %arg7: memref<128x32xf32, #tpu.memory_space<vmem>>, %arg8: memref<6x32xf32, #tpu.memory_space<vmem>>, %arg9: memref<1x8x32xf32, #tpu.memory_space<vmem>>) attributes {dimension_semantics = [#tpu.dimension_semantics<parallel>], iteration_bounds = array<i64: 2>, scalar_prefetch = 0 : i64, scratch_operands = 0 : i64, tpu.core_type = #tpu.core_type<tc>, window_params = [{transform_indices = @transform_0, window_bounds = array<i64: 1, 8, 32>}, {pipeline_mode = #tpu.pipeline_mode<synchronous>, transform_indices = @transform_1, window_bounds = array<i64: 32, 96>}, {pipeline_mode = #tpu.pipeline_mode<synchronous>, transform_indices = @transform_2, window_bounds = array<i64: 1, 96>}, {pipeline_mode = #tpu.pipeline_mode<synchronous>, transform_indices = @transform_3, window_bounds = array<i64: 32, 32>}, {pipeline_mode = #tpu.pipeline_mode<synchronous>, transform_indices = @transform_4, window_bounds = array<i64: 32, 128>}, {pipeline_mode = #tpu.pipeline_mode<synchronous>, transform_indices = @transform_5, window_bounds = array<i64: 1, 128>}, {pipeline_mode = #tpu.pipeline_mode<synchronous>, transform_indices = @transform_6, window_bounds = array<i64: 128, 32>}, {pipeline_mode = #tpu.pipeline_mode<synchronous>, transform_indices = @transform_7, window_bounds = array<i64: 6, 32>}, {transform_indices = @transform_8, window_bounds = array<i64: 1, 8, 32>}]} {
    %c0 = arith.constant 0 : index
    %c0_0 = arith.constant 0 : index
    %c0_1 = arith.constant 0 : index
    %0 = vector.load %arg1[%c0, %c0_0, %c0_1] : memref<1x8x32xf32, #tpu.memory_space<vmem>>, vector<1x8x32xf32>
    %1 = vector.shape_cast %0 : vector<1x8x32xf32> to vector<8x32xf32>
    %c0_2 = arith.constant 0 : index
    %c0_3 = arith.constant 0 : index
    %2 = vector.load %arg2[%c0_2, %c0_3] : memref<32x96xf32, #tpu.memory_space<vmem>>, vector<32x96xf32>
    %cst = arith.constant dense<0.000000e+00> : vector<8x96xf32>
    %3 = tpu.matmul %1, %2, %cst {dimension_numbers = #tpu.dot_dimension_numbers<[1], [0], [0], [1], [0, 0, 1, 1], [], []>} : vector<8x32xf32>, vector<32x96xf32>, vector<8x96xf32> -> vector<8x96xf32>
    %c0_4 = arith.constant 0 : index
    %c0_5 = arith.constant 0 : index
    %4 = vector.load %arg3[%c0_4, %c0_5] : memref<1x96xf32, #tpu.memory_space<vmem>>, vector<1x96xf32>
    %5 = vector.broadcast %4 : vector<1x96xf32> to vector<8x96xf32>
    %6 = arith.addf %3, %5 : vector<8x96xf32>
    %7 = vector.extract_strided_slice %6 {offsets = [0, 0], sizes = [8, 32], strides = [1, 1]} : vector<8x96xf32> to vector<8x32xf32>
    %8 = vector.extract_strided_slice %6 {offsets = [0, 32], sizes = [8, 32], strides = [1, 1]} : vector<8x96xf32> to vector<8x32xf32>
    %9 = vector.extract_strided_slice %6 {offsets = [0, 64], sizes = [8, 32], strides = [1, 1]} : vector<8x96xf32> to vector<8x32xf32>
    %10 = tpu.iota {dimensions = array<i32: 0>} : vector<8x8xi32>
    %11 = tpu.iota {dimensions = array<i32: 1>} : vector<8x8xi32>
    %12 = arith.cmpi sle, %11, %10 : vector<8x8xi32>
    %cst_6 = arith.constant 0.000000e+00 : f32
    %cst_7 = arith.constant -1.000000e+30 : f32
    %13 = vector.broadcast %cst_6 : f32 to vector<8x8xf32>
    %14 = vector.broadcast %cst_7 : f32 to vector<8x8xf32>
    %15 = arith.select %12, %13, %14 : vector<8x8xi1>, vector<8x8xf32>
    %c0_8 = arith.constant 0 : index
    %c0_9 = arith.constant 0 : index
    %16 = vector.load %arg4[%c0_8, %c0_9] : memref<32x32xf32, #tpu.memory_space<vmem>>, vector<32x32xf32>
    %cst_10 = arith.constant 0.000000e+00 : f32
    %17 = vector.broadcast %cst_10 : f32 to vector<8x32xf32>
    %18 = vector.extract_strided_slice %7 {offsets = [0, 0], sizes = [8, 8], strides = [1, 1]} : vector<8x32xf32> to vector<8x8xf32>
    %19 = vector.extract_strided_slice %8 {offsets = [0, 0], sizes = [8, 8], strides = [1, 1]} : vector<8x32xf32> to vector<8x8xf32>
    %20 = vector.extract_strided_slice %9 {offsets = [0, 0], sizes = [8, 8], strides = [1, 1]} : vector<8x32xf32> to vector<8x8xf32>
    %cst_11 = arith.constant dense<0.000000e+00> : vector<8x8xf32>
    %21 = tpu.matmul %18, %19, %cst_11 {dimension_numbers = #tpu.dot_dimension_numbers<[1], [1], [0], [0], [0, 0, 1, 0], [], []>} : vector<8x8xf32>, vector<8x8xf32>, vector<8x8xf32> -> vector<8x8xf32>
    %22 = arith.addf %21, %15 : vector<8x8xf32>
    %cst_12 = arith.constant dense<0xFF800000> : vector<8xf32>
    %23 = vector.multi_reduction <maximumf>, %22, %cst_12 [1] : vector<8x8xf32> to vector<8xf32>
    %24 = vector.shape_cast %23 : vector<8xf32> to vector<8x1xf32>
    %25 = vector.broadcast %24 : vector<8x1xf32> to vector<8x8xf32>
    %26 = arith.subf %22, %25 : vector<8x8xf32>
    %27 = math.exp %26 : vector<8x8xf32>
    %cst_13 = arith.constant dense<0.000000e+00> : vector<8xf32>
    %28 = vector.multi_reduction <add>, %27, %cst_13 [1] : vector<8x8xf32> to vector<8xf32>
    %29 = vector.shape_cast %28 : vector<8xf32> to vector<8x1xf32>
    %30 = vector.broadcast %29 : vector<8x1xf32> to vector<8x8xf32>
    %31 = arith.divf %27, %30 : vector<8x8xf32>
    %cst_14 = arith.constant dense<0.000000e+00> : vector<8x8xf32>
    %32 = tpu.matmul %31, %20, %cst_14 {dimension_numbers = #tpu.dot_dimension_numbers<[1], [0], [0], [1], [0, 0, 1, 1], [], []>} : vector<8x8xf32>, vector<8x8xf32>, vector<8x8xf32> -> vector<8x8xf32>
    %33 = vector.extract_strided_slice %16 {offsets = [0, 0], sizes = [8, 32], strides = [1, 1]} : vector<32x32xf32> to vector<8x32xf32>
    %cst_15 = arith.constant dense<0.000000e+00> : vector<8x32xf32>
    %34 = tpu.matmul %32, %33, %cst_15 {dimension_numbers = #tpu.dot_dimension_numbers<[1], [0], [0], [1], [0, 0, 1, 1], [], []>} : vector<8x8xf32>, vector<8x32xf32>, vector<8x32xf32> -> vector<8x32xf32>
    %35 = arith.addf %17, %34 : vector<8x32xf32>
    %36 = vector.extract_strided_slice %7 {offsets = [0, 8], sizes = [8, 8], strides = [1, 1]} : vector<8x32xf32> to vector<8x8xf32>
    %37 = vector.extract_strided_slice %8 {offsets = [0, 8], sizes = [8, 8], strides = [1, 1]} : vector<8x32xf32> to vector<8x8xf32>
    %38 = vector.extract_strided_slice %9 {offsets = [0, 8], sizes = [8, 8], strides = [1, 1]} : vector<8x32xf32> to vector<8x8xf32>
    %cst_16 = arith.constant dense<0.000000e+00> : vector<8x8xf32>
    %39 = tpu.matmul %36, %37, %cst_16 {dimension_numbers = #tpu.dot_dimension_numbers<[1], [1], [0], [0], [0, 0, 1, 0], [], []>} : vector<8x8xf32>, vector<8x8xf32>, vector<8x8xf32> -> vector<8x8xf32>
    %40 = arith.addf %39, %15 : vector<8x8xf32>
    %cst_17 = arith.constant dense<0xFF800000> : vector<8xf32>
    %41 = vector.multi_reduction <maximumf>, %40, %cst_17 [1] : vector<8x8xf32> to vector<8xf32>
    %42 = vector.shape_cast %41 : vector<8xf32> to vector<8x1xf32>
    %43 = vector.broadcast %42 : vector<8x1xf32> to vector<8x8xf32>
    %44 = arith.subf %40, %43 : vector<8x8xf32>
    %45 = math.exp %44 : vector<8x8xf32>
    %cst_18 = arith.constant dense<0.000000e+00> : vector<8xf32>
    %46 = vector.multi_reduction <add>, %45, %cst_18 [1] : vector<8x8xf32> to vector<8xf32>
    %47 = vector.shape_cast %46 : vector<8xf32> to vector<8x1xf32>
    %48 = vector.broadcast %47 : vector<8x1xf32> to vector<8x8xf32>
    %49 = arith.divf %45, %48 : vector<8x8xf32>
    %cst_19 = arith.constant dense<0.000000e+00> : vector<8x8xf32>
    %50 = tpu.matmul %49, %38, %cst_19 {dimension_numbers = #tpu.dot_dimension_numbers<[1], [0], [0], [1], [0, 0, 1, 1], [], []>} : vector<8x8xf32>, vector<8x8xf32>, vector<8x8xf32> -> vector<8x8xf32>
    %51 = vector.extract_strided_slice %16 {offsets = [8, 0], sizes = [8, 32], strides = [1, 1]} : vector<32x32xf32> to vector<8x32xf32>
    %cst_20 = arith.constant dense<0.000000e+00> : vector<8x32xf32>
    %52 = tpu.matmul %50, %51, %cst_20 {dimension_numbers = #tpu.dot_dimension_numbers<[1], [0], [0], [1], [0, 0, 1, 1], [], []>} : vector<8x8xf32>, vector<8x32xf32>, vector<8x32xf32> -> vector<8x32xf32>
    %53 = arith.addf %35, %52 : vector<8x32xf32>
    %54 = vector.extract_strided_slice %7 {offsets = [0, 16], sizes = [8, 8], strides = [1, 1]} : vector<8x32xf32> to vector<8x8xf32>
    %55 = vector.extract_strided_slice %8 {offsets = [0, 16], sizes = [8, 8], strides = [1, 1]} : vector<8x32xf32> to vector<8x8xf32>
    %56 = vector.extract_strided_slice %9 {offsets = [0, 16], sizes = [8, 8], strides = [1, 1]} : vector<8x32xf32> to vector<8x8xf32>
    %cst_21 = arith.constant dense<0.000000e+00> : vector<8x8xf32>
    %57 = tpu.matmul %54, %55, %cst_21 {dimension_numbers = #tpu.dot_dimension_numbers<[1], [1], [0], [0], [0, 0, 1, 0], [], []>} : vector<8x8xf32>, vector<8x8xf32>, vector<8x8xf32> -> vector<8x8xf32>
    %58 = arith.addf %57, %15 : vector<8x8xf32>
    %cst_22 = arith.constant dense<0xFF800000> : vector<8xf32>
    %59 = vector.multi_reduction <maximumf>, %58, %cst_22 [1] : vector<8x8xf32> to vector<8xf32>
    %60 = vector.shape_cast %59 : vector<8xf32> to vector<8x1xf32>
    %61 = vector.broadcast %60 : vector<8x1xf32> to vector<8x8xf32>
    %62 = arith.subf %58, %61 : vector<8x8xf32>
    %63 = math.exp %62 : vector<8x8xf32>
    %cst_23 = arith.constant dense<0.000000e+00> : vector<8xf32>
    %64 = vector.multi_reduction <add>, %63, %cst_23 [1] : vector<8x8xf32> to vector<8xf32>
    %65 = vector.shape_cast %64 : vector<8xf32> to vector<8x1xf32>
    %66 = vector.broadcast %65 : vector<8x1xf32> to vector<8x8xf32>
    %67 = arith.divf %63, %66 : vector<8x8xf32>
    %cst_24 = arith.constant dense<0.000000e+00> : vector<8x8xf32>
    %68 = tpu.matmul %67, %56, %cst_24 {dimension_numbers = #tpu.dot_dimension_numbers<[1], [0], [0], [1], [0, 0, 1, 1], [], []>} : vector<8x8xf32>, vector<8x8xf32>, vector<8x8xf32> -> vector<8x8xf32>
    %69 = vector.extract_strided_slice %16 {offsets = [16, 0], sizes = [8, 32], strides = [1, 1]} : vector<32x32xf32> to vector<8x32xf32>
    %cst_25 = arith.constant dense<0.000000e+00> : vector<8x32xf32>
    %70 = tpu.matmul %68, %69, %cst_25 {dimension_numbers = #tpu.dot_dimension_numbers<[1], [0], [0], [1], [0, 0, 1, 1], [], []>} : vector<8x8xf32>, vector<8x32xf32>, vector<8x32xf32> -> vector<8x32xf32>
    %71 = arith.addf %53, %70 : vector<8x32xf32>
    %72 = vector.extract_strided_slice %7 {offsets = [0, 24], sizes = [8, 8], strides = [1, 1]} : vector<8x32xf32> to vector<8x8xf32>
    %73 = vector.extract_strided_slice %8 {offsets = [0, 24], sizes = [8, 8], strides = [1, 1]} : vector<8x32xf32> to vector<8x8xf32>
    %74 = vector.extract_strided_slice %9 {offsets = [0, 24], sizes = [8, 8], strides = [1, 1]} : vector<8x32xf32> to vector<8x8xf32>
    %cst_26 = arith.constant dense<0.000000e+00> : vector<8x8xf32>
    %75 = tpu.matmul %72, %73, %cst_26 {dimension_numbers = #tpu.dot_dimension_numbers<[1], [1], [0], [0], [0, 0, 1, 0], [], []>} : vector<8x8xf32>, vector<8x8xf32>, vector<8x8xf32> -> vector<8x8xf32>
    %76 = arith.addf %75, %15 : vector<8x8xf32>
    %cst_27 = arith.constant dense<0xFF800000> : vector<8xf32>
    %77 = vector.multi_reduction <maximumf>, %76, %cst_27 [1] : vector<8x8xf32> to vector<8xf32>
    %78 = vector.shape_cast %77 : vector<8xf32> to vector<8x1xf32>
    %79 = vector.broadcast %78 : vector<8x1xf32> to vector<8x8xf32>
    %80 = arith.subf %76, %79 : vector<8x8xf32>
    %81 = math.exp %80 : vector<8x8xf32>
    %cst_28 = arith.constant dense<0.000000e+00> : vector<8xf32>
    %82 = vector.multi_reduction <add>, %81, %cst_28 [1] : vector<8x8xf32> to vector<8xf32>
    %83 = vector.shape_cast %82 : vector<8xf32> to vector<8x1xf32>
    %84 = vector.broadcast %83 : vector<8x1xf32> to vector<8x8xf32>
    %85 = arith.divf %81, %84 : vector<8x8xf32>
    %cst_29 = arith.constant dense<0.000000e+00> : vector<8x8xf32>
    %86 = tpu.matmul %85, %74, %cst_29 {dimension_numbers = #tpu.dot_dimension_numbers<[1], [0], [0], [1], [0, 0, 1, 1], [], []>} : vector<8x8xf32>, vector<8x8xf32>, vector<8x8xf32> -> vector<8x8xf32>
    %87 = vector.extract_strided_slice %16 {offsets = [24, 0], sizes = [8, 32], strides = [1, 1]} : vector<32x32xf32> to vector<8x32xf32>
    %cst_30 = arith.constant dense<0.000000e+00> : vector<8x32xf32>
    %88 = tpu.matmul %86, %87, %cst_30 {dimension_numbers = #tpu.dot_dimension_numbers<[1], [0], [0], [1], [0, 0, 1, 1], [], []>} : vector<8x8xf32>, vector<8x32xf32>, vector<8x32xf32> -> vector<8x32xf32>
    %89 = arith.addf %71, %88 : vector<8x32xf32>
    %c0_31 = arith.constant 0 : index
    %c0_32 = arith.constant 0 : index
    %90 = vector.load %arg8[%c0_31, %c0_32] : memref<6x32xf32, #tpu.memory_space<vmem>>, vector<1x32xf32>
    %91 = vector.broadcast %90 : vector<1x32xf32> to vector<8x32xf32>
    %92 = arith.addf %89, %91 : vector<8x32xf32>
    %c1 = arith.constant 1 : index
    %c0_33 = arith.constant 0 : index
    %93 = vector.load %arg8[%c1, %c0_33] : memref<6x32xf32, #tpu.memory_space<vmem>>, vector<1x32xf32>
    %c2 = arith.constant 2 : index
    %c0_34 = arith.constant 0 : index
    %94 = vector.load %arg8[%c2, %c0_34] : memref<6x32xf32, #tpu.memory_space<vmem>>, vector<1x32xf32>
    %95 = arith.addf %1, %92 : vector<8x32xf32>
    %cst_35 = arith.constant dense<0.000000e+00> : vector<8xf32>
    %96 = vector.multi_reduction <add>, %95, %cst_35 [1] : vector<8x32xf32> to vector<8xf32>
    %97 = vector.shape_cast %96 : vector<8xf32> to vector<8x1xf32>
    %cst_36 = arith.constant 3.200000e+01 : f32
    %98 = vector.broadcast %cst_36 : f32 to vector<8x1xf32>
    %99 = arith.divf %97, %98 : vector<8x1xf32>
    %100 = vector.broadcast %99 : vector<8x1xf32> to vector<8x32xf32>
    %101 = arith.subf %95, %100 : vector<8x32xf32>
    %102 = arith.mulf %101, %101 : vector<8x32xf32>
    %cst_37 = arith.constant dense<0.000000e+00> : vector<8xf32>
    %103 = vector.multi_reduction <add>, %102, %cst_37 [1] : vector<8x32xf32> to vector<8xf32>
    %104 = vector.shape_cast %103 : vector<8xf32> to vector<8x1xf32>
    %cst_38 = arith.constant 3.200000e+01 : f32
    %105 = vector.broadcast %cst_38 : f32 to vector<8x1xf32>
    %106 = arith.divf %104, %105 : vector<8x1xf32>
    %107 = vector.broadcast %99 : vector<8x1xf32> to vector<8x32xf32>
    %108 = arith.subf %95, %107 : vector<8x32xf32>
    %cst_39 = arith.constant 9.99999974E-6 : f32
    %109 = vector.broadcast %cst_39 : f32 to vector<8x1xf32>
    %110 = arith.addf %106, %109 : vector<8x1xf32>
    %111 = math.rsqrt %110 : vector<8x1xf32>
    %112 = vector.broadcast %111 : vector<8x1xf32> to vector<8x32xf32>
    %113 = arith.mulf %108, %112 : vector<8x32xf32>
    %114 = vector.broadcast %93 : vector<1x32xf32> to vector<8x32xf32>
    %115 = arith.mulf %113, %114 : vector<8x32xf32>
    %116 = vector.broadcast %94 : vector<1x32xf32> to vector<8x32xf32>
    %117 = arith.addf %115, %116 : vector<8x32xf32>
    %c0_40 = arith.constant 0 : index
    %c0_41 = arith.constant 0 : index
    %118 = vector.load %arg5[%c0_40, %c0_41] : memref<32x128xf32, #tpu.memory_space<vmem>>, vector<32x128xf32>
    %cst_42 = arith.constant dense<0.000000e+00> : vector<8x128xf32>
    %119 = tpu.matmul %117, %118, %cst_42 {dimension_numbers = #tpu.dot_dimension_numbers<[1], [0], [0], [1], [0, 0, 1, 1], [], []>} : vector<8x32xf32>, vector<32x128xf32>, vector<8x128xf32> -> vector<8x128xf32>
    %c0_43 = arith.constant 0 : index
    %c0_44 = arith.constant 0 : index
    %120 = vector.load %arg6[%c0_43, %c0_44] : memref<1x128xf32, #tpu.memory_space<vmem>>, vector<1x128xf32>
    %121 = vector.broadcast %120 : vector<1x128xf32> to vector<8x128xf32>
    %122 = arith.addf %119, %121 : vector<8x128xf32>
    %cst_45 = arith.constant 0.000000e+00 : f32
    %123 = vector.broadcast %cst_45 : f32 to vector<8x128xf32>
    %124 = arith.maximumf %122, %123 : vector<8x128xf32>
    %c0_46 = arith.constant 0 : index
    %c0_47 = arith.constant 0 : index
    %125 = vector.load %arg7[%c0_46, %c0_47] : memref<128x32xf32, #tpu.memory_space<vmem>>, vector<128x32xf32>
    %cst_48 = arith.constant dense<0.000000e+00> : vector<8x32xf32>
    %126 = tpu.matmul %124, %125, %cst_48 {dimension_numbers = #tpu.dot_dimension_numbers<[1], [0], [0], [1], [0, 0, 1, 1], [], []>} : vector<8x128xf32>, vector<128x32xf32>, vector<8x32xf32> -> vector<8x32xf32>
    %c5 = arith.constant 5 : index
    %c0_49 = arith.constant 0 : index
    %127 = vector.load %arg8[%c5, %c0_49] : memref<6x32xf32, #tpu.memory_space<vmem>>, vector<1x32xf32>
    %128 = vector.broadcast %127 : vector<1x32xf32> to vector<8x32xf32>
    %129 = arith.addf %126, %128 : vector<8x32xf32>
    %c3 = arith.constant 3 : index
    %c0_50 = arith.constant 0 : index
    %130 = vector.load %arg8[%c3, %c0_50] : memref<6x32xf32, #tpu.memory_space<vmem>>, vector<1x32xf32>
    %c4 = arith.constant 4 : index
    %c0_51 = arith.constant 0 : index
    %131 = vector.load %arg8[%c4, %c0_51] : memref<6x32xf32, #tpu.memory_space<vmem>>, vector<1x32xf32>
    %132 = arith.addf %117, %129 : vector<8x32xf32>
    %cst_52 = arith.constant dense<0.000000e+00> : vector<8xf32>
    %133 = vector.multi_reduction <add>, %132, %cst_52 [1] : vector<8x32xf32> to vector<8xf32>
    %134 = vector.shape_cast %133 : vector<8xf32> to vector<8x1xf32>
    %cst_53 = arith.constant 3.200000e+01 : f32
    %135 = vector.broadcast %cst_53 : f32 to vector<8x1xf32>
    %136 = arith.divf %134, %135 : vector<8x1xf32>
    %137 = vector.broadcast %136 : vector<8x1xf32> to vector<8x32xf32>
    %138 = arith.subf %132, %137 : vector<8x32xf32>
    %139 = arith.mulf %138, %138 : vector<8x32xf32>
    %cst_54 = arith.constant dense<0.000000e+00> : vector<8xf32>
    %140 = vector.multi_reduction <add>, %139, %cst_54 [1] : vector<8x32xf32> to vector<8xf32>
    %141 = vector.shape_cast %140 : vector<8xf32> to vector<8x1xf32>
    %cst_55 = arith.constant 3.200000e+01 : f32
    %142 = vector.broadcast %cst_55 : f32 to vector<8x1xf32>
    %143 = arith.divf %141, %142 : vector<8x1xf32>
    %144 = vector.broadcast %136 : vector<8x1xf32> to vector<8x32xf32>
    %145 = arith.subf %132, %144 : vector<8x32xf32>
    %cst_56 = arith.constant 9.99999974E-6 : f32
    %146 = vector.broadcast %cst_56 : f32 to vector<8x1xf32>
    %147 = arith.addf %143, %146 : vector<8x1xf32>
    %148 = math.rsqrt %147 : vector<8x1xf32>
    %149 = vector.broadcast %148 : vector<8x1xf32> to vector<8x32xf32>
    %150 = arith.mulf %145, %149 : vector<8x32xf32>
    %151 = vector.broadcast %130 : vector<1x32xf32> to vector<8x32xf32>
    %152 = arith.mulf %150, %151 : vector<8x32xf32>
    %153 = vector.broadcast %131 : vector<1x32xf32> to vector<8x32xf32>
    %154 = arith.addf %152, %153 : vector<8x32xf32>
    %c0_57 = arith.constant 0 : index
    %c0_58 = arith.constant 0 : index
    %c0_59 = arith.constant 0 : index
    %155 = vector.load %arg9[%c0_57, %c0_58, %c0_59] : memref<1x8x32xf32, #tpu.memory_space<vmem>>, vector<1x8x32xf32>
    %156 = vector.shape_cast %155 : vector<1x8x32xf32> to vector<8x32xf32>
    %157 = vector.shape_cast %154 : vector<8x32xf32> to vector<1x8x32xf32>
    tpu.vector_store %arg9[%c0_57, %c0_58, %c0_59], %157 {strides = array<i32>} : memref<1x8x32xf32, #tpu.memory_space<vmem>>, vector<1x8x32xf32>,
    return
  }
  func.func @transform_0(%arg0: i32) -> (i32, i32, i32) {
    %c0_i32 = arith.constant 0 : i32
    %c0_i32_0 = arith.constant 0 : i32
    %c0_i32_1 = arith.constant 0 : i32
    return %arg0, %c0_i32, %c0_i32_0 : i32, i32, i32
  }
  func.func @transform_1(%arg0: i32) -> (i32, i32) {
    %c0_i32 = arith.constant 0 : i32
    %c0_i32_0 = arith.constant 0 : i32
    %c0_i32_1 = arith.constant 0 : i32
    return %c0_i32, %c0_i32_0 : i32, i32
  }
  func.func @transform_2(%arg0: i32) -> (i32, i32) {
    %c0_i32 = arith.constant 0 : i32
    %c0_i32_0 = arith.constant 0 : i32
    %c0_i32_1 = arith.constant 0 : i32
    return %c0_i32, %c0_i32_0 : i32, i32
  }
  func.func @transform_3(%arg0: i32) -> (i32, i32) {
    %c0_i32 = arith.constant 0 : i32
    %c0_i32_0 = arith.constant 0 : i32
    %c0_i32_1 = arith.constant 0 : i32
    return %c0_i32, %c0_i32_0 : i32, i32
  }
  func.func @transform_4(%arg0: i32) -> (i32, i32) {
    %c0_i32 = arith.constant 0 : i32
    %c0_i32_0 = arith.constant 0 : i32
    %c0_i32_1 = arith.constant 0 : i32
    return %c0_i32, %c0_i32_0 : i32, i32
  }
  func.func @transform_5(%arg0: i32) -> (i32, i32) {
    %c0_i32 = arith.constant 0 : i32
    %c0_i32_0 = arith.constant 0 : i32
    %c0_i32_1 = arith.constant 0 : i32
    return %c0_i32, %c0_i32_0 : i32, i32
  }
  func.func @transform_6(%arg0: i32) -> (i32, i32) {
    %c0_i32 = arith.constant 0 : i32
    %c0_i32_0 = arith.constant 0 : i32
    %c0_i32_1 = arith.constant 0 : i32
    return %c0_i32, %c0_i32_0 : i32, i32
  }
  func.func @transform_7(%arg0: i32) -> (i32, i32) {
    %c0_i32 = arith.constant 0 : i32
    %c0_i32_0 = arith.constant 0 : i32
    %c0_i32_1 = arith.constant 0 : i32
    return %c0_i32, %c0_i32_0 : i32, i32
  }
  func.func @transform_8(%arg0: i32) -> (i32, i32, i32) {
    %c0_i32 = arith.constant 0 : i32
    %c0_i32_0 = arith.constant 0 : i32
    %c0_i32_1 = arith.constant 0 : i32
    return %arg0, %c0_i32, %c0_i32_0 : i32, i32, i32
  }
}

</mosaic_0001>

<bundles_post_ra>
// kernel: tpu_custom_call.1
= control target key start
LH: loop header
LB: loop body
LE: loop exit
PB: predicated region body
PF: predicated region fallthrough
CT: control target
= control target key end

     0   :  { %13 = vsyncpa [#allocation3], 0  ;;  %s2378_s0 = inlined_call_operand.vmem [shape: f32[2,8,32], index: 0, kind: input, shape index: {}]   ;;  %s2379_s1 = inlined_call_operand.vmem [shape: f32[32,96], index: 1, kind: input, shape index: {}]   ;;  %s2380_s2 = inlined_call_operand.vmem [shape: f32[1,96], index: 2, kind: input, shape index: {}]   ;;  %s2381_s3 = inlined_call_operand.vmem [shape: f32[32,32], index: 3, kind: input, shape index: {}]   ;;  %s2382_s4 = inlined_call_operand.vmem [shape: f32[32,128], index: 4, kind: input, shape index: {}]   ;;  %s2383_s5 = inlined_call_operand.vmem [shape: f32[1,128], index: 5, kind: input, shape index: {}]   ;;  %s2384_s6 = inlined_call_operand.vmem [shape: f32[128,32], index: 6, kind: input, shape index: {}]   ;;  %s2385_s7 = inlined_call_operand.vmem [shape: f32[6,32], index: 7, kind: input, shape index: {}]   ;;  %s2386_s8 = inlined_call_operand.hbm [shape: f32[2,8,32], index: 8, kind: output, shape index: {}]  }
   0x1   :  { %15 = vsyncpa [#allocation3 + $0x1], 0  ;;  %s2059_s27 = smov 0   ;;  %s2061_s28 = smov 0  }
   0x2   :  { %s2063_s29 = smov 0   ;;  %s2065_s30 = smov 0  }
   0x3 LB: > { %s2080_s9 = sadd.s32 4294967295, %s1997_s30   ;;  %s1660_s10 = sadd.s32 4294967294, %s1997_s30   ;;  %s1997_s30 = sphi %s2065_s30, %s2392_s30   ;;  %s1993_s29 = sphi %s2063_s29, %s2391_s29   ;;  %s1989_s28 = sphi %s2061_s28, %s2390_s28   ;;  %s1985_s27 = sphi %s2059_s27, %s2389_s27  }
   0x4   : > { %s2084_s11 = sadd.s32 1, %s1997_s30   ;;  %s201_s12 = sadd.s32 1, %s1993_s29 }
   0x5   : > { %s198_s13 = ssub.s32 %s1997_s30, %s2084_s11  ;;  %p211_p0 = scmp.ne.s32.totalorder %s1993_s29, %s1989_s28 }
   0x6   : > { %p199_p1 = scmp.eq.s32.totalorder %s198_s13, 0  ;;  %p212_p2 = scmp.eq.s32.totalorder %s2080_s9, 1 }
   0x7   : > { %p217_p3 = scmp.ne.s32.totalorder %s1989_s28, %s1985_s27  ;;  %p218_p4 = scmp.eq.s32.totalorder %s1660_s10, 1 }
   0x8   : > { %s2095_s14 = scalar_select %p199_p1, %s1993_s29, %s201_s12  }
   0x9   : > { %p2097_p5 = por %p212_p2, %p211_p0  ;;  %p2101_p6 = por %p218_p4, %p217_p3 }
   0xa   : > { %p1663_p7 = scmp.ge.s32.totalorder %s1997_s30, 1  ;;  %p264_p8 = scmp.lt.s32.totalorder %s1997_s30, 3 }
   0xc   : > { %p265_p9 = pnand %p1663_p7, %p264_p8 }
   0xd   : > { %p297_p10 = scmp.lt.s32.totalorder (!%p265_p9), %s2080_s9, 1  ;;  %s2001_s19 = smov (!%p265_p9), 64  }
   0xe   : > { %268 = sbr.rel (%p265_p9) target bundleno = 3989 (0xf95), region = 52  ;;  %s2002_s20 = smov (!%p265_p9), 96  }
   0xf   : > { %s2005_s22 = smov (!%p265_p9), 120   ;;  %s2006_s25 = smov (!%p265_p9), 56  }
  0x10   : > { %s2007_s26 = smov (!%p265_p9), 80   ;;  %s2008_s10 = smov (!%p265_p9), 112  }
  0x11   : > { %s2009_s17 = smov (!%p265_p9), 48   ;;  %s2010_s18 = smov (!%p265_p9), 72  }
  0x12   : > { %s294_s23 = sand.u32 (!%p265_p9), 1, %s1989_s28  }
  0x13   : > { %v305_v0 = vld [vmem:[%s2379_s1 + $0x18] sm:$0xff]  ;;  %v1999_v1 = vmov 0.0   ;;  %v304_v2 = vld [vmem:[%s2379_s1 + $0x10] sm:$0xff]  ;;  %vm2000_vm0 = vmmov 0   ;;  %s298_s21 = scalar_select %p297_p10, %s2080_s9, 1  ;;  %v303_v3 = vld [vmem:[%s2379_s1 + $0x8] sm:$0xff]  ;;  %v387_v12 = vlaneseq }
  0x14   : > { %1747 = vmatprep.subr.mxu0 %v1999_v1  ;;  %1755 = vmatprep.mubr.msk.f32.mxu0 %vm2000_vm0, %v1999_v1  ;;  %v302_v4 = vld [vmem:[%s2379_s1] sm:$0xff]  ;;  %vm313_vm1 = vcmask 261120   ;;  %vm400_vm2 = vcmask 64512   ;;  %v2004_v15 = vmov -1e+30   ;;  %v394_v49 = vld [vmem:[%s2381_s3 + $0x8] sm:$0xff] }
  0x15   : > { %1748 = vmatpush3.msra.mxu0 %v305_v0  ;;  %1783 = vmatprep.subr.mxu1 %v1999_v1  ;;  %s1665_s24 = sshll.u32 %s298_s21, 3  ;;  %v1666_v6 = vld [vmem:[%s2380_s2] ss:$0 sm:$0xff]  ;;  %s2003_s21 = smov 88   ;;  %v388_v13 = vshrl.u32 %v387_v12, 7  ;;  %v390_v14 = vand.u32 127, %v387_v12 }
  0x16   : > { %1749 = vmatprep.subr.mxu0 %v1999_v1  ;;  %1785 = vmatprep.mubr.msk.f32.mxu1 %vm2000_vm0, %v1999_v1  ;;  %s300_s13 = scalar_lea.vmem %s2378_s0, %s1665_s24  ;;  %v393_v31 = vld [vmem:[%s2381_s3] sm:$0xff]  ;;  %s1664_s24 = sshll.u32 %s294_s23, 3 }
  0x17   : > { %1750 = vmatpush3.msra.mxu0 %v304_v2  ;;  %v2132_v5 = vld [vmem:[%s300_s13] sm:$0xff]  ;;  %vm391_vm3 = vcmp.le.s32.totalorder %v390_v14, %v388_v13  ;;  %1784 = vmatpush3.msra.mxu1 %v393_v31  ;;  %s1693_s13 = sshll.u32 %s2080_s9, 7 }
  0x18   : > { %1751 = vmatprep.subr.mxu0 %v1999_v1  ;;  %v2155_v16 = vsel %vm391_vm3, 0.0, %v2004_v15  ;;  %1793 = vmatprep.subr.mxu1 %v1999_v1 }
  0x19   : > { %1752 = vmatpush3.msra.mxu0 %v303_v3 }
  0x1a   : > { %1753 = vmatprep.subr.mxu0 %v1999_v1 }
  0x1b   : > { %1754 = vmatpush3.msra.mxu0 %v302_v4 }
  0x1c   : > { %1756 = vmatmul.mubr.msk.f32.vlgmr.msra.gmra.mxu0 %vm313_vm1, %v2132_v5  ;;  %1758 = vmatprep.subr.mxu0 %v1999_v1 }
  0x1d   : > { %1760 = vmatprep.mubr.msk.f32.mxu0 %vm2000_vm0, %v1999_v1 }
  0xdc   : > { %v383_v7 = vpop.f32.mrf.mxu0 }
  0xdd   : > { %v2143_v8 = vadd.f32 %v1666_v6, %v383_v7 }
  0xde   : > { %v1757_v9 = vpop.f32.mrf.mxu0 }
  0xdf   : > { %486 = vrot.lane.b32.xlu1 %v2143_v8, %s2001_s19  ;;  %398 = vrot.lane.b32.xlu0 %v2143_v8, %s2002_s20  ;;  %s2011_s19 = smov 104  }
  0xe3   : > { %564 = vrot.lane.b32.xlu1 %v2143_v8, %s2003_s21  ;;  %s1599_s21 = scalar_lea.hbm %s2386_s8, %s1693_s13 }
 0x151   : > { %v399_v10 = vpop.permute.xlu0 %398  ;;  %v487_v11 = vpop.permute.xlu1 %486 }
 0x152   : > { %1759 = vmatpush3.xpose.msk.msra.mxu0 %vm400_vm2, %v399_v10  ;;  %v395_v10 = vld [vmem:[%s2381_s3 + $0x10] sm:$0xff] }
 0x153   : > { %1763 = vmatprep.subr.mxu0 %v1999_v1 }
 0x155   : > { %1761 = vmatmul.mubr.msk.f32.vlgmr.msra.gmra.mxu0 %vm400_vm2, %v2143_v8  ;;  %v565_v26 = vpop.permute.xlu1 %564 }
 0x156   : > { %1764 = vmatpush3.msra.mxu0 %v487_v11  ;;  %1765 = vmatprep.mubr.msk.f32.mxu0 %vm2000_vm0, %v1999_v1 }
 0x157   : > { %1768 = vmatprep.subr.mxu0 %v1999_v1 }
 0x215   : > { %v471_v17 = vpop.f32.mrf.mxu0 }
 0x216   : > { %v472_v18 = vadd.f32 %v471_v17, %v2155_v16 }
 0x217   : > { %v1762_v19 = vpop.f32.mrf.mxu0 }
 0x218   : > { %v475_v20 = vsel %vm400_vm2, %v472_v18, -inf }
 0x219   : > { %476 = vmax.xlane.f32.xlu0 %v475_v20 }
 0x2a2   : > { %v477_v21 = vpop.xlane.xlu0 %476 }
 0x2a3   : > { %v478_v22 = vsub.f32 %v472_v18, %v477_v21 }
 0x2a5   : > { %v479_v23 = vmul.f32 1.442695, %v478_v22 }
 0x2a7   : > { %1917 = vpow2.f32 %v479_v23  ;;  %v396_v23 = vld [vmem:[%s2381_s3 + $0x18] sm:$0xff] }
 0x2b4   : > { %v1918_v24 = vpop.eup %1917 }
 0x2b5   : > { %v481_v25 = vsel %vm400_vm2, %v1918_v24, 0.0 }
 0x2b6   : > { %482 = vadd.xlane.f32.xlu1 %v481_v25 }
 0x2c7   : > { %562 = vrot.lane.b32.xlu1 %v2143_v8, %s2005_s22  ;;  %s2012_s22 = smov 40  }
 0x33f   : > { %v483_v27 = vpop.xlane.xlu1 %482 }
 0x340   : > { %1919 = vrcp.f32 %v483_v27 }
 0x343   : > { %v563_v30 = vpop.permute.xlu1 %562 }
 0x34d   : > { %v1920_v28 = vpop.eup %1919 }
 0x34e   : > { %v485_v29 = vmul.f32 %v1920_v28, %v1918_v24 }
 0x350   : > { %1766 = vmatmul.mubr.msk.f32.vlgmr.msra.gmra.mxu0 %vm400_vm2, %v485_v29 }
 0x351   : > { %1769 = vmatpush3.xpose.msk.msra.mxu0 %vm400_vm2, %v565_v26  ;;  %1770 = vmatprep.mubr.msk.f32.mxu0 %vm2000_vm0, %v1999_v1 }
 0x352   : > { %1773 = vmatprep.subr.mxu0 %v1999_v1 }
 0x354   : > { %1771 = vmatmul.mubr.msk.f32.vlgmr.msra.gmra.mxu0 %vm400_vm2, %v563_v30 }
 0x355   : > { %1775 = vmatprep.mubr.msk.f32.mxu0 %vm2000_vm0, %v1999_v1 }
 0x410   : > { %v558_v32 = vpop.f32.mrf.mxu0 }
 0x411   : > { %1786 = vmatmul.mubr.msk.f32.vlgmr.msra.gmra.mxu1 %vm400_vm2, %v558_v32 }
 0x412   : > { %v1767_v33 = vpop.f32.mrf.mxu0  ;;  %1795 = vmatprep.mubr.msk.f32.mxu1 %vm2000_vm0, %v1999_v1 }
 0x413   : > { %v1684_v33 = vld [vmem:[%s2385_s7] ss:$0 sm:$0xff] }
 0x414   : > { %v636_v34 = vpop.f32.mrf.mxu0 }
 0x415   : > { %v637_v35 = vadd.f32 %v636_v34, %v2155_v16 }
 0x416   : > { %v1772_v36 = vpop.f32.mrf.mxu0 }
 0x417   : > { %v640_v37 = vsel %vm400_vm2, %v637_v35, -inf }
 0x418   : > { %641 = vmax.xlane.f32.xlu1 %v640_v37 }
 0x4a1   : > { %v642_v38 = vpop.xlane.xlu1 %641 }
 0x4a2   : > { %v643_v39 = vsub.f32 %v637_v35, %v642_v38 }
 0x4a4   : > { %v644_v40 = vmul.f32 1.442695, %v643_v39 }
 0x4a6   : > { %1921 = vpow2.f32 %v644_v40 }
 0x4b3   : > { %v1922_v41 = vpop.eup %1921 }
 0x4b4   : > { %v646_v42 = vsel %vm400_vm2, %v1922_v41, 0.0 }
 0x4b5   : > { %647 = vadd.xlane.f32.xlu0 %v646_v42 }
 0x4cb   : > { %651 = vrot.lane.b32.xlu0 %v2143_v8, %s2006_s25 }
 0x4cf   : > { %875 = vrot.lane.b32.xlu0 %v2143_v8, %s2007_s26  ;;  %s2013_s26 = smov [#allocation2]  }
 0x4d1   : > { %v2181_v43 = vpop.f32.mrf.mxu1 }
 0x4d3   : > { %v1787_v44 = vpop.f32.mrf.mxu1  ;;  %873 = vrot.lane.b32.xlu0 %v2143_v8, %s2008_s10  ;;  %s1941_s10 = sshll.u32 %s2013_s26, 4  ;;  %s1942_s10 = int_to_ptr.vmem [resolvable:$false] %s1941_s10 }
 0x4d4   : > { %v1387_v44 = vld [vmem:[%s2382_s4 + $0x18] sm:$0xff]  ;;  %s1943_s9 = scalar_lea.vmem %s1942_s10, 256 }
 0x53e   : > { %v648_v45 = vpop.xlane.xlu0 %647 }
 0x53f   : > { %1923 = vrcp.f32 %v648_v45  ;;  %v1386_v45 = vld [vmem:[%s2382_s4 + $0x10] sm:$0xff] }
 0x542   : > { %v652_v46 = vpop.permute.xlu0 %651 }
 0x543   : > { %1774 = vmatpush3.msra.mxu0 %v652_v46  ;;  %v1384_v46 = vld [vmem:[%s2382_s4] sm:$0xff] }
 0x544   : > { %1778 = vmatprep.subr.mxu0 %v1999_v1 }
 0x546   : > { %v876_v50 = vpop.permute.xlu0 %875 }
 0x54a   : > { %v874_v53 = vpop.permute.xlu0 %873 }
 0x54c   : > { %v1924_v47 = vpop.eup %1923 }
 0x54d   : > { %v650_v48 = vmul.f32 %v1924_v47, %v1922_v41  ;;  %v1484_v47 = vld [vmem:[%s2384_s6 + $0x78] sm:$0xff] }
 0x54f   : > { %1776 = vmatmul.mubr.msk.f32.vlgmr.msra.gmra.mxu0 %vm400_vm2, %v650_v48  ;;  %v1483_v48 = vld [vmem:[%s2384_s6 + $0x70] sm:$0xff] }
 0x550   : > { %1779 = vmatpush3.msra.mxu0 %v394_v49  ;;  %1780 = vmatprep.mubr.msk.f32.mxu0 %vm2000_vm0, %v1999_v1  ;;  %v1482_v49 = vld [vmem:[%s2384_s6 + $0x68] sm:$0xff] }
 0x551   : > { %1788 = vmatprep.subr.mxu0 %v1999_v1 }
 0x60f   : > { %v723_v51 = vpop.f32.mrf.mxu0 }
 0x610   : > { %1781 = vmatmul.mubr.msk.f32.vlgmr.msra.gmra.mxu0 %vm400_vm2, %v723_v51  ;;  %v1480_v51 = vld [vmem:[%s2384_s6 + $0x58] sm:$0xff] }
 0x611   : > { %1789 = vmatpush3.xpose.msk.msra.mxu0 %vm400_vm2, %v876_v50  ;;  %v1777_v52 = vpop.f32.mrf.mxu0  ;;  %1790 = vmatprep.mubr.msk.f32.mxu0 %vm2000_vm0, %v1999_v1  ;;  %v1481_v50 = vld [vmem:[%s2384_s6 + $0x60] sm:$0xff] }
 0x612   : > { %1798 = vmatprep.subr.mxu0 %v1999_v1  ;;  %v1479_v52 = vld [vmem:[%s2384_s6 + $0x50] sm:$0xff] }
 0x614   : > { %1791 = vmatmul.mubr.msk.f32.vlgmr.msra.gmra.mxu0 %vm400_vm2, %v874_v53  ;;  %v1478_v53 = vld [vmem:[%s2384_s6 + $0x48] sm:$0xff] }
 0x615   : > { %1800 = vmatprep.mubr.msk.f32.mxu0 %vm2000_vm0, %v1999_v1  ;;  %1799 = vmatpush3.msra.mxu0 %v395_v10  ;;  %v1469_v10 = vld [vmem:[%s2384_s6] sm:$0xff] }
 0x616   : > { %1808 = vmatprep.subr.mxu0 %v1999_v1 }
 0x6d0   : > { %v796_v54 = vpop.f32.mrf.mxu0 }
 0x6d2   : > { %v1782_v55 = vpop.f32.mrf.mxu0 }
 0x6d3   : > { %v1476_v55 = vld [vmem:[%s2384_s6 + $0x38] sm:$0xff] }
 0x6d4   : > { %v947_v56 = vpop.f32.mrf.mxu0 }
 0x6d5   : > { %v948_v57 = vadd.f32 %v947_v56, %v2155_v16  ;;  %v1475_v56 = vld [vmem:[%s2384_s6 + $0x30] sm:$0xff] }
 0x6d6   : > { %v1792_v58 = vpop.f32.mrf.mxu0 }
 0x6d7   : > { %v951_v59 = vsel %vm400_vm2, %v948_v57, -inf  ;;  %v1473_v58 = vld [vmem:[%s2384_s6 + $0x20] sm:$0xff] }
 0x6d8   : > { %952 = vmax.xlane.f32.xlu1 %v951_v59  ;;  %v1472_v59 = vld [vmem:[%s2384_s6 + $0x18] sm:$0xff] }
 0x6e9   : > { %962 = vrot.lane.b32.xlu1 %v2143_v8, %s2009_s17  ;;  %s296_s17 = scalar_lea.vmem [#allocation2], %s1664_s24 }
 0x6ed   : > { %1114 = vrot.lane.b32.xlu1 %v2143_v8, %s2010_s18  ;;  %s1601_s18 = sshll.u32 %s296_s17, 4  ;;  %s1602_s18 = int_to_ptr.vmem [resolvable:$true] %s1601_s18 }
 0x6ee   : > { %s1937_s25 = scalar_lea.vmem %s1602_s18, 128  ;;  %p1944_p0 = scmp.lt.s32.totalorder %s1602_s18, %s1942_s10 }
 0x6ef   : > { %p1938_p11 = scmp.ne.s32.totalorder %s1602_s18, %s1937_s25  ;;  %p1945_p1 = scmp.lt.s32.totalorder %s1943_s9, %s1937_s25 }
 0x6f1   : > { %1112 = vrot.lane.b32.xlu1 %v2143_v8, %s2011_s19  ;;  %p1939_p12 = pnand %p1938_p11, %p2097_p5  ;;  %p1946_p2 = por %p1945_p1, %p1944_p0 }
 0x6f3   : > { %p1940_p13 = pneg %p1939_p12 }
 0x6f5   : > { %p1947_p3 = pnand %p1946_p2, %p1940_p13 }
 0x761   : > { %v953_v60 = vpop.xlane.xlu1 %952 }
 0x762   : > { %v954_v61 = vsub.f32 %v948_v57, %v953_v60  ;;  %v1474_v57 = vld [vmem:[%s2384_s6 + $0x28] sm:$0xff] }
 0x764   : > { %v955_v62 = vmul.f32 1.442695, %v954_v61 }
 0x765   : > { %v963_v63 = vpop.permute.xlu1 %962 }
 0x766   : > { %1925 = vpow2.f32 %v955_v62  ;;  %1794 = vmatpush3.msra.mxu1 %v963_v63 }
 0x767   : > { %1803 = vmatprep.subr.mxu1 %v1999_v1 }
 0x769   : > { %v1115_v6 = vpop.permute.xlu1 %1114 }
 0x76d   : > { %v1113_v9 = vpop.permute.xlu1 %1112 }
 0x773   : > { %v1926_v0 = vpop.eup %1925 }
 0x774   : > { %v957_v2 = vsel %vm400_vm2, %v1926_v0, 0.0 }
 0x775   : > { %958 = vadd.xlane.f32.xlu0 %v957_v2 }
 0x7fe   : > { %v959_v3 = vpop.xlane.xlu0 %958 }
 0x7ff   : > { %1927 = vrcp.f32 %v959_v3  ;;  %v1686_v3 = vld [vmem:[%s2385_s7 + $0x2] ss:$0 sm:$0xff] }
 0x80c   : > { %v1928_v4 = vpop.eup %1927 }
 0x80d   : > { %v961_v7 = vmul.f32 %v1928_v4, %v1926_v0  ;;  %v1685_v0 = vld [vmem:[%s2385_s7 + $0x1] ss:$0 sm:$0xff] }
 0x80f   : > { %1796 = vmatmul.mubr.msk.f32.vlgmr.msra.gmra.mxu1 %vm400_vm2, %v961_v7  ;;  %v1471_v7 = vld [vmem:[%s2384_s6 + $0x10] sm:$0xff] }
 0x810   : > { %1804 = vmatpush3.xpose.msk.msra.mxu1 %vm400_vm2, %v1115_v6  ;;  %1805 = vmatprep.mubr.msk.f32.mxu1 %vm2000_vm0, %v1999_v1 }
 0x811   : > { %1813 = vmatprep.subr.mxu1 %v1999_v1 }
 0x813   : > { %1806 = vmatmul.mubr.msk.f32.vlgmr.msra.gmra.mxu1 %vm400_vm2, %v1113_v9  ;;  %v1470_v9 = vld [vmem:[%s2384_s6 + $0x8] sm:$0xff] }
 0x814   : > { %1815 = vmatprep.mubr.msk.f32.mxu1 %vm2000_vm0, %v1999_v1  ;;  %1814 = vmatpush3.msra.mxu1 %v396_v23 }
 0x815   : > { %1829 = vmatprep.subr.mxu1 %v1999_v1 }
 0x8cf   : > { %v1034_v11 = vpop.f32.mrf.mxu1 }
 0x8d0   : > { %1801 = vmatmul.mubr.msk.f32.vlgmr.msra.gmra.mxu0 %vm400_vm2, %v1034_v11  ;;  %v1687_v11 = vld [vmem:[%s2383_s5] ss:$0 sm:$0xff] }
 0x8d1   : > { %v1797_v12 = vpop.f32.mrf.mxu1  ;;  %1810 = vmatprep.mubr.msk.f32.mxu0 %vm2000_vm0, %v1999_v1 }
 0x8d3   : > { %v1186_v13 = vpop.f32.mrf.mxu1 }
 0x8d4   : > { %v1187_v14 = vadd.f32 %v1186_v13, %v2155_v16  ;;  %v870_v16 = vadd.f32 %v2181_v43, %v796_v54  ;;  %v1477_v54 = vld [vmem:[%s2384_s6 + $0x40] sm:$0xff] }
 0x8d5   : > { %v1807_v15 = vpop.f32.mrf.mxu1 }
 0x8d6   : > { %v1190_v17 = vsel %vm400_vm2, %v1187_v14, -inf }
 0x8d7   : > { %1191 = vmax.xlane.f32.xlu1 %v1190_v17  ;;  %v1689_v17 = vld [vmem:[%s2385_s7 + $0x5] ss:$0 sm:$0xff] }
 0x960   : > { %v1192_v18 = vpop.xlane.xlu1 %1191 }
 0x961   : > { %v1193_v19 = vsub.f32 %v1187_v14, %v1192_v18 }
 0x963   : > { %v1194_v20 = vmul.f32 1.442695, %v1193_v19 }
 0x965   : > { %1929 = vpow2.f32 %v1194_v20 }
 0x972   : > { %v1930_v21 = vpop.eup %1929 }
 0x973   : > { %v1196_v22 = vsel %vm400_vm2, %v1930_v21, 0.0 }
 0x974   : > { %1197 = vadd.xlane.f32.xlu0 %v1196_v22 }
 0x98a   : > { %1201 = vrot.lane.b32.xlu0 %v2143_v8, %s2012_s22  ;;  %s1588_s22 = scalar_lea.sflag [#allocation3], %s294_s23 }
 0x990   : > { %v1107_v24 = vpop.f32.mrf.mxu0 }
 0x991   : > { %v1111_v25 = vadd.f32 %v1107_v24, %v870_v16 }
 0x992   : > { %v1802_v26 = vpop.f32.mrf.mxu0 }
 0x9fd   : > { %v1198_v27 = vpop.xlane.xlu0 %1197 }
 0x9fe   : > { %1931 = vrcp.f32 %v1198_v27 }
 0xa01   : > { %v1202_v28 = vpop.permute.xlu0 %1201 }
 0xa02   : > { %1809 = vmatpush3.msra.mxu0 %v1202_v28 }
 0xa03   : > { %1818 = vmatprep.subr.mxu0 %v1999_v1 }
 0xa0b   : > { %v1932_v29 = vpop.eup %1931 }
 0xa0c   : > { %v1200_v8 = vmul.f32 %v1932_v29, %v1930_v21 }
 0xa0e   : > { %1811 = vmatmul.mubr.msk.f32.vlgmr.msra.gmra.mxu0 %vm400_vm2, %v1200_v8  ;;  %v1690_v8 = vld [vmem:[%s2385_s7 + $0x3] ss:$0 sm:$0xff] }
 0xa0f   : > { %1826 = vmatprep.mubr.msk.f32.mxu0 %vm2000_vm0, %v1999_v1  ;;  %1819 = vmatpush3.msra.mxu0 %v1387_v44 }
 0xa10   : > { %1820 = vmatprep.subr.mxu0 %v1999_v1 }
 0xa11   : > { %1821 = vmatpush3.msra.mxu0 %v1386_v45 }
 0xa12   : > { %1822 = vmatprep.subr.mxu0 %v1999_v1 }
 0xace   : > { %v1273_v30 = vpop.f32.mrf.mxu0 }
 0xacf   : > { %1816 = vmatmul.mubr.msk.f32.vlgmr.msra.gmra.mxu1 %vm400_vm2, %v1273_v30 }
 0xad0   : > { %v1812_v31 = vpop.f32.mrf.mxu0  ;;  %1861 = vmatprep.mubr.msk.f32.mxu1 %vm2000_vm0, %v1999_v1  ;;  %1830 = vmatpush3.msra.mxu1 %v1484_v47 }
 0xad1   : > { %1831 = vmatprep.subr.mxu1 %v1999_v1  ;;  %v1691_v31 = vld [vmem:[%s2385_s7 + $0x4] ss:$0 sm:$0xff] }
 0xad2   : > { %1832 = vmatpush3.msra.mxu1 %v1483_v48 }
 0xad3   : > { %1833 = vmatprep.subr.mxu1 %v1999_v1 }
 0xad4   : > { %1834 = vmatpush3.msra.mxu1 %v1482_v49 }
 0xad5   : > { %1835 = vmatprep.subr.mxu1 %v1999_v1 }
 0xad6   : > { %1836 = vmatpush3.msra.mxu1 %v1481_v50 }
 0xad7   : > { %1837 = vmatprep.subr.mxu1 %v1999_v1 }
 0xad8   : > { %1838 = vmatpush3.msra.mxu1 %v1480_v51 }
 0xad9   : > { %1839 = vmatprep.subr.mxu1 %v1999_v1 }
 0xada   : > { %1840 = vmatpush3.msra.mxu1 %v1479_v52 }
 0xadb   : > { %1841 = vmatprep.subr.mxu1 %v1999_v1 }
 0xadc   : > { %1842 = vmatpush3.msra.mxu1 %v1478_v53 }
 0xadd   : > { %1843 = vmatprep.subr.mxu1 %v1999_v1 }
 0xade   : > { %1844 = vmatpush3.msra.mxu1 %v1477_v54 }
 0xadf   : > { %1845 = vmatprep.subr.mxu1 %v1999_v1 }
 0xae0   : > { %1846 = vmatpush3.msra.mxu1 %v1476_v55 }
 0xae1   : > { %1847 = vmatprep.subr.mxu1 %v1999_v1 }
 0xae2   : > { %1848 = vmatpush3.msra.mxu1 %v1475_v56 }
 0xae3   : > { %1849 = vmatprep.subr.mxu1 %v1999_v1 }
 0xae4   : > { %1850 = vmatpush3.msra.mxu1 %v1474_v57 }
 0xae5   : > { %1851 = vmatprep.subr.mxu1 %v1999_v1 }
 0xae6   : > { %1852 = vmatpush3.msra.mxu1 %v1473_v58 }
 0xae7   : > { %1853 = vmatprep.subr.mxu1 %v1999_v1 }
 0xae8   : > { %1854 = vmatpush3.msra.mxu1 %v1472_v59 }
 0xae9   : > { %1855 = vmatprep.subr.mxu1 %v1999_v1 }
 0xaea   : > { %1856 = vmatpush3.msra.mxu1 %v1471_v7 }
 0xaeb   : > { %1857 = vmatprep.subr.mxu1 %v1999_v1 }
 0xaec   : > { %1858 = vmatpush3.msra.mxu1 %v1470_v9 }
 0xaed   : > { %1859 = vmatprep.subr.mxu1 %v1999_v1 }
 0xaee   : > { %1860 = vmatpush3.msra.mxu1 %v1469_v10 }
 0xb8f   : > { %v1346_v32 = vpop.f32.mrf.mxu1 }
 0xb90   : > { %v1350_v34 = vadd.f32 %v1346_v32, %v1111_v25 }
 0xb91   : > { %v1817_v35 = vpop.f32.mrf.mxu1 }
 0xb92   : > { %v1356_v36 = vadd.f32 %v1684_v33, %v1350_v34 }
 0xb94   : > { %v1359_v37 = vadd.f32 %v1356_v36, %v2132_v5  ;;  %v1385_v5 = vld [vmem:[%s2382_s4 + $0x8] sm:$0xff] }
 0xb95   : > { %1823 = vmatpush3.msra.mxu0 %v1385_v5 }
 0xb96   : > { %v1360_v38 = vsel %vm313_vm1, %v1359_v37, 0.0  ;;  %1824 = vmatprep.subr.mxu0 %v1999_v1 }
 0xb97   : > { %1361 = vadd.xlane.f32.xlu0 %v1360_v38  ;;  %1825 = vmatpush3.msra.mxu0 %v1384_v46 }
 0xc20   : > { %v1362_v39 = vpop.xlane.xlu0 %1361 }
 0xc21   : > { %v1364_v40 = vmul.f32 0.03125, %v1362_v39 }
 0xc23   : > { %v1365_v41 = vsub.f32 %v1359_v37, %v1364_v40 }
 0xc25   : > { %v1366_v42 = vmul.f32 %v1365_v41, %v1365_v41 }
 0xc27   : > { %v1367_v43 = vsel %vm313_vm1, %v1366_v42, 0.0 }
 0xc28   : > { %1368 = vadd.xlane.f32.xlu1 %v1367_v43 }
 0xcb1   : > { %v1369_v60 = vpop.xlane.xlu1 %1368 }
 0xcb2   : > { %v1370_v61 = vmul.f32 0.03125, %v1369_v60 }
 0xcb4   : > { %v1371_v62 = vadd.f32 1e-05, %v1370_v61 }
 0xcb6   : > { %1933 = vrsqrt.f32 %v1371_v62 }
 0xcc3   : > { %v1934_v63 = vpop.eup %1933 }
 0xcc4   : > { %v1373_v2 = vmul.f32 %v1934_v63, %v1365_v41 }
 0xcc6   : > { %v1378_v4 = vmul.f32 %v1685_v0, %v1373_v2 }
 0xcc8   : > { %v1383_v6 = vadd.f32 %v1686_v3, %v1378_v4 }
 0xcca   : > { %1827 = vmatmul.mubr.msk.f32.vlgmr.msra.gmra.mxu0 %vm313_vm1, %v1383_v6 }
 0xd8a   : > { %v1464_v12 = vpop.f32.mrf.mxu0 }
 0xd8b   : > { %v1465_v13 = vadd.f32 %v1687_v11, %v1464_v12 }
 0xd8c   : > { %v1828_v14 = vpop.f32.mrf.mxu0 }
 0xd8d   : > { %v1468_v15 = vmax.f32 %v1465_v13, 0.0 }
 0xd8f   : > { %1862 = vmatmul.mubr.f32.vlgmr.msra.gmra.mxu1 %v1468_v15 }
 0xe4f   : > { %v1556_v18 = vpop.f32.mrf.mxu1 }
 0xe50   : > { %v1557_v19 = vadd.f32 %v1689_v17, %v1556_v18 }
 0xe51   : > { %v1863_v20 = vpop.f32.mrf.mxu1 }
 0xe52   : > { %v1562_v21 = vadd.f32 %v1557_v19, %v1383_v6 }
 0xe54   : > { %v1563_v1 = vsel %vm313_vm1, %v1562_v21, 0.0 }
 0xe55   : > { %1564 = vadd.xlane.f32.xlu1 %v1563_v1 }
 0xede   : > { %v1565_v22 = vpop.xlane.xlu1 %1564 }
 0xedf   : > { %v1566_v23 = vmul.f32 0.03125, %v1565_v22 }
 0xee1   : > { %v1567_v16 = vsub.f32 %v1562_v21, %v1566_v23 }
 0xee3   : > { %v1568_v24 = vmul.f32 %v1567_v16, %v1567_v16 }
 0xee5   : > { %v1569_v25 = vsel %vm313_vm1, %v1568_v24, 0.0 }
 0xee6   : > { %1570 = vadd.xlane.f32.xlu1 %v1569_v25 }
 0xf6f   : > { %v1571_v26 = vpop.xlane.xlu1 %1570 }
 0xf70   : > { %v1572_v27 = vmul.f32 0.03125, %v1571_v26 }
 0xf72   : > { %v1573_v28 = vadd.f32 1e-05, %v1572_v27 }
 0xf74   : > { %1935 = vrsqrt.f32 %v1573_v28 }
 0xf81   : > { %v1936_v29 = vpop.eup %1935 }
 0xf82   : > { %v1575_v30 = vmul.f32 %v1936_v29, %v1567_v16 }
 0xf84   : > { %v1580_v32 = vmul.f32 %v1690_v8, %v1575_v30 }
 0xf86   : > { %v1585_v33 = vadd.f32 %v1691_v31, %v1580_v32 }
 0xf88   : > { %1586 = vst.msk [vmem:[%s296_s17] sm:$0xff] %vm313_vm1, %v1585_v33 }
 0xf89   : > { %1950 = shalt.err (!%p1947_p3)
}
 0xf8a   : > { %s1951_s24 = scalar_lea.hbm %s1599_s21, 128  ;;  %s1955_s13 = scalar_lea.hbm %s2386_s8, 256 }
 0xf8b   : > { %p1952_p4 = scmp.ne.s32.totalorder %s1599_s21, %s1951_s24  ;;  %p1956_p9 = scmp.lt.s32.totalorder %s1599_s21, %s2386_s8 }
 0xf8c   : > { %p1957_p10 = scmp.lt.s32.totalorder %s1955_s13, %s1951_s24 }
 0xf8d   : > { %p1953_p7 = pnand %p1952_p4, %p2097_p5 }
 0xf8e   : > { %p1958_p11 = por %p1957_p10, %p1956_p9 }
 0xf8f   : > { %p1954_p8 = pneg %p1953_p7 }
 0xf91   : > { %p1959_p12 = pnand %p1958_p11, %p1954_p8 }
 0xf93   : > { %1962 = shalt.err (!%p1959_p12)
}
 0xf94   : > { %1864 = dma.vmem_to_hbm [thread:$0]  (%p2097_p5), %s1602_s18, 128, %s1599_s21, %s1588_s22  }
 0xf95 PF: > { %p1870_p13 = scmp.ge.s32.totalorder %s1997_s30, 2  ;;  %s1613_s20 = sand.u32 1, %s1985_s27  }
 0xf96   : > { %s1614_s25 = scalar_lea.sflag [#allocation3], %s1613_s20 }
 0xf97   : > { %p1867_p0 = pnand %p1870_p13, %p2101_p6 }
 0xf99   : > { %p1868_p1 = pneg %p1867_p0 }
 0xf9b   : > { %1980 = dma.done.wait (%p1868_p1), %s1614_s25, 128  }
 0xf9c   : > { %1982 = vsyncadd (%p1868_p1), %s1614_s25, 4294967168  ;;  %p18_p2 = scmp.ge.s32.totalorder %s2084_s11, 4   ;;  %s2389_s27 = smov %s1989_s28 }
 0xf9d   : > { %s2390_s28 = smov %s1993_s29  ;;  %s2391_s29 = smov %s2095_s14 }
 0xf9e   : > { %s2392_s30 = smov %s2084_s11  ;;  %20 = sbr.rel (!%p18_p2) target bundleno = 3 (0x3), region = 87 }
 0xfa3   :  { %1619 = vsyncpa [#allocation3], 1 }
 0xfa4   :  { %1621 = vsyncpa [#allocation3 + $0x1], 1 }

</bundles_post_ra>
